<compile_context>
chip_gen: v6e
topology: v6e:2x2x1
jax: 0.10.0
libtpu: 0.0.40
codegen_flags: <defaults>
</compile_context>

<pallas_src>
import functools

import jax
import jax.numpy as jnp
from jax.experimental import pallas as pl
from jax.experimental.pallas import tpu as pltpu


def wm_kernel(obs_ref, w_ref, b_ref, out_ref, acc_ref, *, d_conv, d_esn):
    """Fused matmul (+ optional K accumulation) + per-lane-block activation.

    obs_ref: (TB, TK)     f32  — cast to bf16 right before the dot
    w_ref:   (TK, N_PAD)  bf16 (= [W_conv | W_esn | 0 | zero-pad] K-slice)
    b_ref:   (1, N_PAD)   f32  (= [b_conv | 0 | 1 | zero-pad])
    out_ref: (TB, N_PAD)  f32
    acc_ref: (TB, N_PAD)  f32  VMEM accumulator scratch
    """
    k = pl.program_id(1)

    @pl.when(k == 0)
    def _():
        acc_ref[...] = jnp.zeros_like(acc_ref)

    a = obs_ref[...].astype(jnp.bfloat16)  # in-kernel cast: no extra HBM pass
    acc_ref[...] += jnp.dot(a, w_ref[...], preferred_element_type=jnp.float32)

    @pl.when(k == pl.num_programs(1) - 1)
    def _():
        z = acc_ref[...] + b_ref[...]                  # bias add in f32
        n_pad = z.shape[1]
        d_sum = d_conv + d_esn
        # Static per-128-lane-block activation: tanh only where the ESN
        # columns actually live; relu only on conv columns; identity on the
        # ones/pad columns.  Mixed (boundary) blocks use an iota mask.
        for nb in range(n_pad // 128):
            lo = nb * 128
            hi = lo + 128
            zb = z[:, lo:hi]
            if hi <= d_conv:                           # pure conv block
                act = jnp.maximum(zb, 0.0)
            elif lo >= d_conv and hi <= d_sum:         # pure ESN block
                act = jnp.tanh(zb)
            elif lo >= d_sum:                          # ones / padding block
                act = zb
            else:                                      # boundary block
                col = jax.lax.broadcasted_iota(jnp.int32, zb.shape, 1) + lo
                act = jnp.where(
                    col < d_conv, jnp.maximum(zb, 0.0),
                    jnp.where(col < d_sum, jnp.tanh(zb), zb))
            out_ref[:, lo:hi] = act.astype(out_ref.dtype)


def prepare_wm_params(w_conv, b_conv, w_esn):
    """One-time fusion of weights/bias (hoisted out of the forward pass).

    Returns (w_fused_bf16, b_fused_f32, d_conv, d_esn).  The trailing ones
    column is folded into the f32 bias against an exactly-zero weight column,
    so it stays exactly 1.0 in the output.
    """
    F, d_conv = w_conv.shape
    d_esn = w_esn.shape[1]
    n_out = d_conv + d_esn + 1
    n_pad = ((n_out + 127) // 128) * 128               # lane-dense output width

    w_fused = jnp.zeros((F, n_pad), jnp.float32)
    w_fused = w_fused.at[:, :d_conv].set(w_conv)
    w_fused = w_fused.at[:, d_conv:d_conv + d_esn].set(w_esn)
    b_fused = jnp.zeros((1, n_pad), jnp.float32)
    b_fused = b_fused.at[:, :d_conv].set(b_conv.reshape(1, d_conv))
    b_fused = b_fused.at[:, d_conv + d_esn].set(1.0)
    return w_fused.astype(jnp.bfloat16), b_fused, d_conv, d_esn


def _pick_tile(n, cap, align):
    """Largest multiple of `align` that divides `n` and is <= cap (0 if none)."""
    best = 0
    cap = min(cap, n)
    d = align
    while d <= cap:
        if n % d == 0:
            best = d
        d += align
    return best


def _select_tiles(b_pad, F, n_pad, tile_b_cap, vmem_budget):
    """Derive (tb, tk, n_k, vmem_limit_bytes) from a VMEM working-set budget."""
    # Batch tile: largest multiple-of-8 divisor of b_pad; cap at b_pad//2 when
    # possible so the "parallel" axis has >= 2 steps (v7x dual TensorCores).
    if b_pad >= 16:
        tb_cap = max(8, min(tile_b_cap, (b_pad // 2) // 8 * 8))
    else:
        tb_cap = b_pad
    tb = _pick_tile(b_pad, tb_cap, 8) or 8

    def vmem_bytes(tb_, tk_):
        obs = 2 * tb_ * tk_ * 4        # f32 obs tile, double buffered
        w = 2 * tk_ * n_pad * 2        # bf16 fused weights, double buffered
        out = 2 * tb_ * n_pad * 4      # f32 output tile, double buffered
        bias = 2 * n_pad * 4
        acc = tb_ * n_pad * 4          # accumulator scratch
        return obs + w + out + bias + acc

    if vmem_bytes(tb, F) <= vmem_budget:
        tk = F                                          # single-pass fast path
    else:
        fixed = vmem_bytes(tb, 0)
        per_k = 8 * tb + 4 * n_pad
        tk_cap = max(1, (vmem_budget - fixed) // per_k)
        tk = _pick_tile(F, tk_cap, 256) or _pick_tile(F, tk_cap, 128)
        if not tk:
            # TODO(synk): pad F to a 128 multiple for pathological feature
            # widths; fall back to one oversized pass for now.
            tk = F
    n_k = F // tk
    vmem_limit = int(min(max(vmem_bytes(tb, tk) + (8 << 20), 32 << 20), 56 << 20))
    return tb, tk, n_k, vmem_limit


def wm_forward(obs, w_fused_bf, b_fused, *, d_conv, d_esn,
               tile_b_cap=512, vmem_budget_bytes=40 << 20):
    """WM.forward: S = cat((x_conv, x_esn, ones(B,1)), dim=1)."""
    B = obs.shape[0]
    obs_flat = obs.reshape(B, -1)                      # f32; no wrapper cast pass
    F = obs_flat.shape[1]
    n_pad = w_fused_bf.shape[1]
    n_out = d_conv + d_esn + 1

    # Pad only to the 8-row sublane multiple (no full-copy pad to tile size).
    b_pad = ((B + 7) // 8) * 8
    if b_pad != B:
        obs_flat = jnp.pad(obs_flat, ((0, b_pad - B), (0, 0)))

    tb, tk, n_k, vmem_limit = _select_tiles(
        b_pad, F, n_pad, tile_b_cap, vmem_budget_bytes)

    kernel = functools.partial(wm_kernel, d_conv=d_conv, d_esn=d_esn)
    out = pl.pallas_call(
        kernel,
        out_shape=jax.ShapeDtypeStruct((b_pad, n_pad), jnp.float32),
        grid_spec=pltpu.PrefetchScalarGridSpec(
            num_scalar_prefetch=0,
            grid=(b_pad // tb, n_k),
            in_specs=[
                pl.BlockSpec((tb, tk), lambda i, k: (i, k)),       # obs tile
                pl.BlockSpec((tk, n_pad), lambda i, k: (k, 0)),    # weight K-slice
                pl.BlockSpec((1, n_pad), lambda i, k: (0, 0)),     # bias resident
            ],
            out_specs=pl.BlockSpec((tb, n_pad), lambda i, k: (i, 0)),
            scratch_shapes=[pltpu.VMEM((tb, n_pad), jnp.float32)],
        ),
        compiler_params=pltpu.CompilerParams(
            dimension_semantics=("parallel", "arbitrary"),
            vmem_limit_bytes=vmem_limit,
        ),
    )(obs_flat, w_fused_bf, b_fused)

    # Strip batch padding and lane padding back to Dc + De + 1 columns.
    return out[:B, :n_out]


if __name__ == "__main__":
    # Small, deterministic example shapes.
    B, C, H, W = 2, 4, 16, 16
    F = C * H * W          # 1024 flattened features
    D_CONV = 32            # synthetic conv-feature width
    D_ESN = 16             # synthetic ESN state width

    key = jax.random.PRNGKey(0)
    k_obs, k_wc, k_bc, k_we = jax.random.split(key, 4)

    obs = jax.random.normal(k_obs, (B, C, H, W), dtype=jnp.float32)
    w_conv = jax.random.normal(k_wc, (F, D_CONV), dtype=jnp.float32) * 0.02
    b_conv = jax.random.normal(k_bc, (1, D_CONV), dtype=jnp.float32) * 0.02
    w_esn = jax.random.normal(k_we, (F, D_ESN), dtype=jnp.float32) * 0.02

    # One-time parameter fusion (amortized across forward calls).
    w_fused_bf, b_fused, d_conv, d_esn = prepare_wm_params(w_conv, b_conv, w_esn)
    w_fused_bf, b_fused = jax.block_until_ready((w_fused_bf, b_fused))

    S = wm_forward(obs, w_fused_bf, b_fused, d_conv=d_conv, d_esn=d_esn)
    S = jax.block_until_ready(S)

    # Reference check: same math on bf16-roundtripped operands (the kernel
    # uses bf16 operands with f32 MXU accumulation), bias/activations in f32.
    obs_r = obs.reshape(B, -1).astype(jnp.bfloat16).astype(jnp.float32)
    wc_r = w_conv.astype(jnp.bfloat16).astype(jnp.float32)
    we_r = w_esn.astype(jnp.bfloat16).astype(jnp.float32)
    x_conv_ref = jnp.maximum(obs_r @ wc_r + b_conv, 0.0)
    x_esn_ref = jnp.tanh(obs_r @ we_r)
    S_ref = jnp.concatenate(
        [x_conv_ref, x_esn_ref, jnp.ones((B, 1), jnp.float32)], axis=1)

    assert S.shape == (B, D_CONV + D_ESN + 1), S.shape
    assert jnp.allclose(S, S_ref, atol=5e-3, rtol=5e-3)
    # The ones column must be exactly 1.0 (zero weight column + f32 bias = 1).
    assert jnp.all(S[:, D_CONV + D_ESN] == 1.0)

    print("KERNEL_OK")
</pallas_src>

<mosaic_0001>
module attributes {stable_mosaic.version = 11 : i64} {
  func.func @wm_kernel(%arg0: i32, %arg1: i32, %arg2: memref<8x1024xf32, #tpu.memory_space<vmem>>, %arg3: memref<1024x128xbf16, #tpu.memory_space<vmem>>, %arg4: memref<1x128xf32, #tpu.memory_space<vmem>>, %arg5: memref<8x128xf32, #tpu.memory_space<vmem>>, %arg6: memref<8x128xf32, #tpu.memory_space<vmem>>) attributes {dimension_semantics = [#tpu.dimension_semantics<parallel>, #tpu.dimension_semantics<arbitrary>], iteration_bounds = array<i64: 1, 1>, scalar_prefetch = 0 : i64, scratch_operands = 1 : i64, tpu.core_type = #tpu.core_type<tc>, window_params = [{transform_indices = @transform_0, window_bounds = array<i64: 8, 1024>}, {transform_indices = @transform_1, window_bounds = array<i64: 1024, 128>}, {pipeline_mode = #tpu.pipeline_mode<synchronous>, transform_indices = @transform_2, window_bounds = array<i64: 1, 128>}, {transform_indices = @transform_3, window_bounds = array<i64: 8, 128>}]} {
    %c0_i32 = arith.constant 0 : i32
    %0 = arith.cmpi eq, %arg1, %c0_i32 : i32
    %1 = arith.extui %0 : i1 to i32
    %c0_i32_0 = arith.constant 0 : i32
    %2 = arith.cmpi ne, %1, %c0_i32_0 : i32
    scf.if %2 {
      %cst_10 = arith.constant 0.000000e+00 : f32
      %13 = vector.broadcast %cst_10 : f32 to vector<8x128xf32>
      %c0_11 = arith.constant 0 : index
      %c0_12 = arith.constant 0 : index
      %14 = vector.load %arg6[%c0_11, %c0_12] : memref<8x128xf32, #tpu.memory_space<vmem>>, vector<8x128xf32>
      tpu.vector_store %arg6[%c0_11, %c0_12], %13 {strides = array<i32>} : memref<8x128xf32, #tpu.memory_space<vmem>>, vector<8x128xf32>,
    } else {
    }
    %c0 = arith.constant 0 : index
    %c0_1 = arith.constant 0 : index
    %3 = vector.load %arg2[%c0, %c0_1] : memref<8x1024xf32, #tpu.memory_space<vmem>>, vector<8x1024xf32>
    %4 = arith.truncf %3 : vector<8x1024xf32> to vector<8x1024xbf16>
    %c0_2 = arith.constant 0 : index
    %c0_3 = arith.constant 0 : index
    %5 = vector.load %arg6[%c0_2, %c0_3] : memref<8x128xf32, #tpu.memory_space<vmem>>, vector<8x128xf32>
    %c0_4 = arith.constant 0 : index
    %c0_5 = arith.constant 0 : index
    %6 = vector.load %arg3[%c0_4, %c0_5] : memref<1024x128xbf16, #tpu.memory_space<vmem>>, vector<1024x128xbf16>
    %cst = arith.constant dense<0.000000e+00> : vector<8x128xf32>
    %7 = tpu.matmul %4, %6, %cst {dimension_numbers = #tpu.dot_dimension_numbers<[1], [0], [0], [1], [0, 0, 1, 1], [], []>} : vector<8x1024xbf16>, vector<1024x128xbf16>, vector<8x128xf32> -> vector<8x128xf32>
    %8 = arith.addf %5, %7 : vector<8x128xf32>
    %c0_6 = arith.constant 0 : index
    %c0_7 = arith.constant 0 : index
    %9 = vector.load %arg6[%c0_6, %c0_7] : memref<8x128xf32, #tpu.memory_space<vmem>>, vector<8x128xf32>
    tpu.vector_store %arg6[%c0_6, %c0_7], %8 {strides = array<i32>} : memref<8x128xf32, #tpu.memory_space<vmem>>, vector<8x128xf32>,
    %c0_i32_8 = arith.constant 0 : i32
    %10 = arith.cmpi eq, %arg1, %c0_i32_8 : i32
    %11 = arith.extui %10 : i1 to i32
    %c0_i32_9 = arith.constant 0 : i32
    %12 = arith.cmpi ne, %11, %c0_i32_9 : i32
    scf.if %12 {
      %c0_10 = arith.constant 0 : index
      %c0_11 = arith.constant 0 : index
      %13 = vector.load %arg6[%c0_10, %c0_11] : memref<8x128xf32, #tpu.memory_space<vmem>>, vector<8x128xf32>
      %c0_12 = arith.constant 0 : index
      %c0_13 = arith.constant 0 : index
      %14 = vector.load %arg4[%c0_12, %c0_13] : memref<1x128xf32, #tpu.memory_space<vmem>>, vector<1x128xf32>
      %15 = vector.broadcast %14 : vector<1x128xf32> to vector<8x128xf32>
      %16 = arith.addf %13, %15 : vector<8x128xf32>
      %17 = tpu.iota {dimensions = array<i32: 1>} : vector<8x128xi32>
      %c0_i32_14 = arith.constant 0 : i32
      %18 = vector.broadcast %c0_i32_14 : i32 to vector<8x128xi32>
      %19 = arith.addi %17, %18 : vector<8x128xi32>
      %c32_i32 = arith.constant 32 : i32
      %20 = vector.broadcast %c32_i32 : i32 to vector<8x128xi32>
      %21 = arith.cmpi slt, %19, %20 : vector<8x128xi32>
      %cst_15 = arith.constant 0.000000e+00 : f32
      %22 = vector.broadcast %cst_15 : f32 to vector<8x128xf32>
      %23 = arith.maximumf %16, %22 : vector<8x128xf32>
      %c48_i32 = arith.constant 48 : i32
      %24 = vector.broadcast %c48_i32 : i32 to vector<8x128xi32>
      %25 = arith.cmpi slt, %19, %24 : vector<8x128xi32>
      %26 = math.tanh %16 : vector<8x128xf32>
      %27 = arith.select %25, %26, %16 : vector<8x128xi1>, vector<8x128xf32>
      %28 = arith.select %21, %23, %27 : vector<8x128xi1>, vector<8x128xf32>
      %c0_16 = arith.constant 0 : index
      %c0_17 = arith.constant 0 : index
      %29 = vector.load %arg5[%c0_16, %c0_17] : memref<8x128xf32, #tpu.memory_space<vmem>>, vector<8x128xf32>
      tpu.vector_store %arg5[%c0_16, %c0_17], %28 {strides = array<i32>} : memref<8x128xf32, #tpu.memory_space<vmem>>, vector<8x128xf32>,
    } else {
    }
    return
  }
  func.func @transform_0(%arg0: i32, %arg1: i32) -> (i32, i32) {
    %c0_i32 = arith.constant 0 : i32
    return %arg0, %arg1 : i32, i32
  }
  func.func @transform_1(%arg0: i32, %arg1: i32) -> (i32, i32) {
    %c0_i32 = arith.constant 0 : i32
    %c0_i32_0 = arith.constant 0 : i32
    return %arg1, %c0_i32 : i32, i32
  }
  func.func @transform_2(%arg0: i32, %arg1: i32) -> (i32, i32) {
    %c0_i32 = arith.constant 0 : i32
    %c0_i32_0 = arith.constant 0 : i32
    %c0_i32_1 = arith.constant 0 : i32
    return %c0_i32, %c0_i32_0 : i32, i32
  }
  func.func @transform_3(%arg0: i32, %arg1: i32) -> (i32, i32) {
    %c0_i32 = arith.constant 0 : i32
    %c0_i32_0 = arith.constant 0 : i32
    return %arg0, %c0_i32 : i32, i32
  }
}

</mosaic_0001>

<bundles_post_ra>
// kernel: tpu_custom_call.1
= control target key start
LH: loop header
LB: loop body
LE: loop exit
PB: predicated region body
PF: predicated region fallthrough
CT: control target
= control target key end

     0   :  { %8 = vsyncpa [#allocation4], 0  ;;  %s1102_s0 = inlined_call_operand.hbm [shape: f32[8,1024], index: 0, kind: input, shape index: {}]   ;;  %s1103_s1 = inlined_call_operand.hbm [shape: bf16[1024,128], index: 1, kind: input, shape index: {}]   ;;  %s1104_s2 = inlined_call_operand.vmem [shape: f32[1,128], index: 2, kind: input, shape index: {}]   ;;  %s1105_s3 = inlined_call_operand.hbm [shape: f32[8,128], index: 3, kind: output, shape index: {}]  }
   0x1   :  { %9 = vsyncpa [#allocation7], 0 }
   0x2   :  { %10 = vsyncpa [#allocation5], 0  ;;  %s1065_s12 = smov [#allocation3]   ;;  %s1066_s14 = smov [#allocation6]  }
   0x3   :  { %s17_s13 = sshll.u32 %s1065_s12, 4  ;;  %s26_s15 = sshll.u32 %s1066_s14, 4  ;;  %s18_s13 = int_to_ptr.vmem [resolvable:$true] %s17_s13  ;;  %s27_s15 = int_to_ptr.vmem [resolvable:$true] %s26_s15 }
   0x4   :  { %s1007_s16 = scalar_lea.vmem %s18_s13, 1024  ;;  %p1012_p1 = scmp.lt.s32.totalorder %s18_s13, %s18_s13 }
   0x5   :  { %p1008_p0 = scmp.ne.s32.totalorder %s18_s13, %s1007_s16  ;;  %p1013_p2 = scmp.lt.s32.totalorder %s1007_s16, %s1007_s16 }
   0x7   :  { %p1014_p3 = por %p1013_p2, %p1012_p1 }
   0x9   :  { %p1015_p4 = pnand %p1014_p3, %p1008_p0 }
   0xb   :  { %1018 = shalt.err (!%p1015_p4)
}
   0xc   :  { %20 = dma.hbm_to_vmem [thread:$0]  %s1102_s0, 1024, %s18_s13, [#allocation4]  }
   0xd   :  { %s1027_s19 = scalar_lea.vmem %s27_s15, 8192  ;;  %p1032_p6 = scmp.lt.s32.totalorder %s27_s15, %s27_s15 }
   0xe   :  { %p1028_p5 = scmp.ne.s32.totalorder %s27_s15, %s1027_s19  ;;  %p1033_p7 = scmp.lt.s32.totalorder %s1027_s19, %s1027_s19 }
  0x10   :  { %p1034_p8 = por %p1033_p7, %p1032_p6 }
  0x12   :  { %p1035_p9 = pnand %p1034_p8, %p1028_p5 }
  0x14   :  { %1038 = shalt.err (!%p1035_p9)
}
  0x15   :  { %s1067_s20 = smov 64   ;;  %s1068_s21 = smov 4  }
  0x16   :  { %32 = dma.hbm_to_vmem [thread:$0]  %s1103_s1, 8192, %s27_s15, [#allocation7], %s1067_s20, %s1067_s20, %s1068_s21  }
  0x17   :  { %1059 = dma.done.wait [#allocation4], 1024  }
  0x18   :  { %1060 = vsyncadd [#allocation4], 4294966272 }
  0x19   :  { %1061 = dma.done.wait [#allocation7], 8192  }
  0x1a   :  { %1062 = vsyncadd [#allocation7], 4294959104  ;;  %v933_v0 = vld [vmem:[#allocation6 + $0x78] sm:$0xff]   ;;  %v937_v4 = vld [vmem:[#allocation6 + $0x70] sm:$0xff]   ;;  %s1069_s24 = smov [#allocation8]  }
  0x1b   :  { %v934_v1 = vld [vmem:[#allocation6 + $0xf8] sm:$0xff]   ;;  %840 = vmatprep.subr.bf16.mxu0 %v933_v0  ;;  %v938_v5 = vld [vmem:[#allocation6 + $0xf0] sm:$0xff]   ;;  %v941_v8 = vld [vmem:[#allocation6 + $0x68] sm:$0xff]   ;;  %s765_s25 = sshll.u32 %s1069_s24, 4  ;;  %s766_s25 = int_to_ptr.vmem [resolvable:$true] %s765_s25 }
  0x1c   :  { %v935_v2 = vld [vmem:[#allocation6 + $0x38] sm:$0xff]   ;;  %862 = vmatprep.subr.bf16.mxu1 %v934_v1  ;;  %v939_v6 = vld [vmem:[#allocation6 + $0x30] sm:$0xff]   ;;  %v942_v9 = vld [vmem:[#allocation6 + $0xe8] sm:$0xff]   ;;  %s1039_s26 = scalar_lea.vmem %s766_s25, 128  ;;  %p1044_p11 = scmp.lt.s32.totalorder %s766_s25, %s766_s25 }
  0x1d   :  { %v936_v3 = vld [vmem:[#allocation6 + $0xb8] sm:$0xff]   ;;  %841 = vmatpush3.bf16.msra.mxu0 %v935_v2  ;;  %v940_v7 = vld [vmem:[#allocation6 + $0xb0] sm:$0xff]   ;;  %v943_v10 = vld [vmem:[#allocation6 + $0x28] sm:$0xff]   ;;  %p1040_p10 = scmp.ne.s32.totalorder %s766_s25, %s1039_s26  ;;  %p1045_p12 = scmp.lt.s32.totalorder %s1039_s26, %s1039_s26 }
  0x1e   :  { %863 = vmatpush3.bf16.msra.mxu1 %v936_v3  ;;  %842 = vmatprep.subr.bf16.mxu0 %v937_v4  ;;  %v944_v11 = vld [vmem:[#allocation6 + $0xa8] sm:$0xff]   ;;  %v945_v12 = vld [vmem:[#allocation6 + $0x60] sm:$0xff]   ;;  %v949_v16 = vld [vmem:[#allocation6 + $0x58] sm:$0xff]  }
  0x1f   :  { %864 = vmatprep.subr.bf16.mxu1 %v938_v5  ;;  %v946_v13 = vld [vmem:[#allocation6 + $0xe0] sm:$0xff]   ;;  %v950_v17 = vld [vmem:[#allocation6 + $0xd8] sm:$0xff]   ;;  %v953_v20 = vld [vmem:[#allocation6 + $0x50] sm:$0xff]   ;;  %p1046_p13 = por %p1045_p12, %p1044_p11 }
  0x20   :  { %v947_v14 = vld [vmem:[#allocation6 + $0x20] sm:$0xff]   ;;  %v951_v18 = vld [vmem:[#allocation6 + $0x18] sm:$0xff]   ;;  %v954_v21 = vld [vmem:[#allocation6 + $0xd0] sm:$0xff]  }
  0x21   :  { %843 = vmatpush3.bf16.msra.mxu0 %v939_v6  ;;  %v948_v15 = vld [vmem:[#allocation6 + $0xa0] sm:$0xff]   ;;  %v952_v19 = vld [vmem:[#allocation6 + $0x98] sm:$0xff]   ;;  %v955_v22 = vld [vmem:[#allocation6 + $0x10] sm:$0xff]   ;;  %p1047_p0 = pnand %p1046_p13, %p1040_p10 }
  0x22   :  { %865 = vmatpush3.bf16.msra.mxu1 %v940_v7  ;;  %844 = vmatprep.subr.bf16.mxu0 %v941_v8  ;;  %v956_v23 = vld [vmem:[#allocation6 + $0x90] sm:$0xff]   ;;  %v957_v24 = vld [vmem:[#allocation6 + $0x48] sm:$0xff]   ;;  %v961_v28 = vld [vmem:[#allocation6 + $0x40] sm:$0xff]  }
  0x23   :  { %866 = vmatprep.subr.bf16.mxu1 %v942_v9  ;;  %v958_v25 = vld [vmem:[#allocation6 + $0xc8] sm:$0xff]   ;;  %v962_v29 = vld [vmem:[#allocation6 + $0xc0] sm:$0xff]   ;;  %v50_v33 = vld [vmem:[#allocation3 + $0x18] sm:$0xff] }
  0x24   :  { %v959_v26 = vld [vmem:[#allocation6 + $0x8] sm:$0xff]   ;;  %v963_v30 = vld [vmem:[#allocation6] sm:$0xff]   ;;  %v58_v36 = vpack.c.bf16 %v50_v33, %v50_v33  ;;  %v49_v38 = vld [vmem:[#allocation3 + $0x10] sm:$0xff] }
  0x25   :  { %845 = vmatpush3.bf16.msra.mxu0 %v943_v10  ;;  %v960_v27 = vld [vmem:[#allocation6 + $0x88] sm:$0xff]   ;;  %v964_v31 = vld [vmem:[#allocation6 + $0x80] sm:$0xff]   ;;  %v57_v39 = vpack.c.bf16 %v49_v38, %v49_v38  ;;  %v965_v40 = vld [vmem:[#allocation6 + $0x178] sm:$0xff]  }
  0x26   :  { %867 = vmatpush3.bf16.msra.mxu1 %v944_v11  ;;  %846 = vmatprep.subr.bf16.mxu0 %v945_v12  ;;  %v48_v32 = vld [vmem:[#allocation3 + $0x8] sm:$0xff]  ;;  %v47_v34 = vld [vmem:[#allocation3] sm:$0xff]  ;;  %v966_v41 = vld [vmem:[#allocation6 + $0x1f8] sm:$0xff]  }
  0x27   :  { %868 = vmatprep.subr.bf16.mxu1 %v946_v13  ;;  %v56_v35 = vpack.c.bf16 %v48_v32, %v48_v32  ;;  %v55_v37 = vpack.c.bf16 %v47_v34, %v47_v34  ;;  %648 = vmatprep.mubr.bf16.mxu1 %v58_v36  ;;  %v967_v42 = vld [vmem:[#allocation6 + $0x138] sm:$0xff]   ;;  %v969_v44 = vld [vmem:[#allocation6 + $0x170] sm:$0xff]   ;;  %v973_v48 = vld [vmem:[#allocation6 + $0x168] sm:$0xff]  }
  0x28   :  { %v968_v43 = vld [vmem:[#allocation6 + $0x1b8] sm:$0xff]   ;;  %v970_v45 = vld [vmem:[#allocation6 + $0x1f0] sm:$0xff]   ;;  %v974_v49 = vld [vmem:[#allocation6 + $0x1e8] sm:$0xff]  }
  0x29   :  { %847 = vmatpush3.bf16.msra.mxu0 %v947_v14  ;;  %608 = vmatprep.mubr.bf16.mxu0 %v56_v35  ;;  %v971_v46 = vld [vmem:[#allocation6 + $0x130] sm:$0xff]   ;;  %v975_v50 = vld [vmem:[#allocation6 + $0x128] sm:$0xff]   ;;  %v977_v52 = vld [vmem:[#allocation6 + $0x160] sm:$0xff]  }
  0x2a   :  { %869 = vmatpush3.bf16.msra.mxu1 %v948_v15  ;;  %848 = vmatprep.subr.bf16.mxu0 %v949_v16  ;;  %v972_v47 = vld [vmem:[#allocation6 + $0x1b0] sm:$0xff]   ;;  %v976_v51 = vld [vmem:[#allocation6 + $0x1a8] sm:$0xff]   ;;  %v978_v53 = vld [vmem:[#allocation6 + $0x1e0] sm:$0xff]  }
  0x2b   :  { %870 = vmatprep.subr.bf16.mxu1 %v950_v17  ;;  %v979_v54 = vld [vmem:[#allocation6 + $0x120] sm:$0xff]   ;;  %v981_v56 = vld [vmem:[#allocation6 + $0x158] sm:$0xff]   ;;  %v985_v60 = vld [vmem:[#allocation6 + $0x150] sm:$0xff]  }
  0x2c   :  { %v980_v55 = vld [vmem:[#allocation6 + $0x1a0] sm:$0xff]   ;;  %v982_v57 = vld [vmem:[#allocation6 + $0x1d8] sm:$0xff]   ;;  %v986_v61 = vld [vmem:[#allocation6 + $0x1d0] sm:$0xff]  }
  0x2d   :  { %849 = vmatpush3.bf16.msra.mxu0 %v951_v18  ;;  %v983_v58 = vld [vmem:[#allocation6 + $0x118] sm:$0xff]   ;;  %v987_v62 = vld [vmem:[#allocation6 + $0x110] sm:$0xff]   ;;  %v989_v0 = vld [vmem:[#allocation6 + $0x148] sm:$0xff]  }
  0x2e   :  { %871 = vmatpush3.bf16.msra.mxu1 %v952_v19  ;;  %850 = vmatprep.subr.bf16.mxu0 %v953_v20  ;;  %v984_v59 = vld [vmem:[#allocation6 + $0x198] sm:$0xff]   ;;  %v988_v63 = vld [vmem:[#allocation6 + $0x190] sm:$0xff]   ;;  %v990_v1 = vld [vmem:[#allocation6 + $0x1c8] sm:$0xff]  }
  0x2f   :  { %872 = vmatprep.subr.bf16.mxu1 %v954_v21  ;;  %v991_v2 = vld [vmem:[#allocation6 + $0x108] sm:$0xff]   ;;  %v993_v4 = vld [vmem:[#allocation6 + $0x140] sm:$0xff]   ;;  %v54_v9 = vld [vmem:[#allocation3 + $0x38] sm:$0xff] }
  0x30   :  { %v992_v3 = vld [vmem:[#allocation6 + $0x188] sm:$0xff]   ;;  %v994_v5 = vld [vmem:[#allocation6 + $0x1c0] sm:$0xff]   ;;  %v62_v11 = vpack.c.bf16 %v54_v9, %v54_v9  ;;  %v53_v13 = vld [vmem:[#allocation3 + $0x30] sm:$0xff] }
  0x31   :  { %851 = vmatpush3.bf16.msra.mxu0 %v955_v22  ;;  %v995_v6 = vld [vmem:[#allocation6 + $0x100] sm:$0xff]   ;;  %v52_v8 = vld [vmem:[#allocation3 + $0x28] sm:$0xff]  ;;  %v61_v15 = vpack.c.bf16 %v53_v13, %v53_v13 }
  0x32   :  { %873 = vmatpush3.bf16.msra.mxu1 %v956_v23  ;;  %852 = vmatprep.subr.bf16.mxu0 %v957_v24  ;;  %v996_v7 = vld [vmem:[#allocation6 + $0x180] sm:$0xff]   ;;  %v60_v10 = vpack.c.bf16 %v52_v8, %v52_v8 }
  0x33   :  { %874 = vmatprep.subr.bf16.mxu1 %v958_v25  ;;  %v51_v12 = vld [vmem:[#allocation3 + $0x20] sm:$0xff] }
  0x34   :  { %v59_v14 = vpack.c.bf16 %v51_v12, %v51_v12  ;;  %v839_v36 = vld [vmem:[%s1104_s2] ss:$0 sm:$0xff] }
  0x35   :  { %853 = vmatpush3.bf16.msra.mxu0 %v959_v26 }
  0x36   :  { %875 = vmatpush3.bf16.msra.mxu1 %v960_v27  ;;  %854 = vmatprep.subr.bf16.mxu0 %v961_v28 }
  0x37   :  { %876 = vmatprep.subr.bf16.mxu1 %v962_v29 }
  0x39   :  { %855 = vmatpush3.bf16.msra.mxu0 %v963_v30 }
  0x3a   :  { %877 = vmatpush3.bf16.msra.mxu1 %v964_v31  ;;  %884 = vmatprep.subr.bf16.mxu0 %v965_v40 }
  0x3b   :  { %906 = vmatprep.subr.bf16.mxu1 %v966_v41  ;;  %v750_v41 = vlaneseq }
  0x3c   :  { %609 = vmatmul.mubr.bf16.vlgmr.msra.gmra.mxu0 %v55_v37 }
  0x3d   :  { %649 = vmatmul.mubr.bf16.vlgmr.msra.gmra.mxu1 %v57_v39  ;;  %885 = vmatpush3.bf16.msra.mxu0 %v967_v42  ;;  %v751_v42 = vand.u32 127, %v750_v41 }
  0x3e   :  { %907 = vmatpush3.bf16.msra.mxu1 %v968_v43  ;;  %886 = vmatprep.subr.bf16.mxu0 %v969_v44 }
  0x3f   :  { %908 = vmatprep.subr.bf16.mxu1 %v970_v45  ;;  %688 = vmatprep.mubr.bf16.mxu0 %v60_v10  ;;  %vm754_vm0 = vcmp.lt.s32.totalorder %v751_v42, 48  ;;  %vm752_vm1 = vcmp.lt.s32.totalorder %v751_v42, 32 }
  0x40   :  { %728 = vmatprep.mubr.bf16.mxu1 %v62_v11 }
  0x41   :  { %887 = vmatpush3.bf16.msra.mxu0 %v971_v46 }
  0x42   :  { %909 = vmatpush3.bf16.msra.mxu1 %v972_v47  ;;  %888 = vmatprep.subr.bf16.mxu0 %v973_v48 }
  0x43   :  { %910 = vmatprep.subr.bf16.mxu1 %v974_v49 }
  0x45   :  { %889 = vmatpush3.bf16.msra.mxu0 %v975_v50 }
  0x46   :  { %911 = vmatpush3.bf16.msra.mxu1 %v976_v51  ;;  %890 = vmatprep.subr.bf16.mxu0 %v977_v52 }
  0x47   :  { %912 = vmatprep.subr.bf16.mxu1 %v978_v53 }
  0x49   :  { %891 = vmatpush3.bf16.msra.mxu0 %v979_v54 }
  0x4a   :  { %913 = vmatpush3.bf16.msra.mxu1 %v980_v55  ;;  %892 = vmatprep.subr.bf16.mxu0 %v981_v56 }
  0x4b   :  { %914 = vmatprep.subr.bf16.mxu1 %v982_v57 }
  0x4d   :  { %893 = vmatpush3.bf16.msra.mxu0 %v983_v58 }
  0x4e   :  { %915 = vmatpush3.bf16.msra.mxu1 %v984_v59  ;;  %894 = vmatprep.subr.bf16.mxu0 %v985_v60 }
  0x4f   :  { %916 = vmatprep.subr.bf16.mxu1 %v986_v61 }
  0x51   :  { %895 = vmatpush3.bf16.msra.mxu0 %v987_v62 }
  0x52   :  { %917 = vmatpush3.bf16.msra.mxu1 %v988_v63  ;;  %896 = vmatprep.subr.bf16.mxu0 %v989_v0 }
  0x53   :  { %918 = vmatprep.subr.bf16.mxu1 %v990_v1 }
  0x55   :  { %897 = vmatpush3.bf16.msra.mxu0 %v991_v2 }
  0x56   :  { %919 = vmatpush3.bf16.msra.mxu1 %v992_v3  ;;  %898 = vmatprep.subr.bf16.mxu0 %v993_v4 }
  0x57   :  { %920 = vmatprep.subr.bf16.mxu1 %v994_v5 }
  0x59   :  { %899 = vmatpush3.bf16.msra.mxu0 %v995_v6 }
  0x5a   :  { %921 = vmatpush3.bf16.msra.mxu1 %v996_v7 }
  0x5c   :  { %689 = vmatmul.mubr.bf16.vlgmr.msra.gmra.mxu0 %v59_v14 }
  0x5d   :  { %729 = vmatmul.mubr.bf16.vlgmr.msra.gmra.mxu1 %v61_v15 }
  0xfc   :  { %v856_v16 = vpop.f32.mrf.mxu0 }
  0xfd   :  { %v878_v17 = vpop.f32.mrf.mxu1 }
  0xfe   :  { %v857_v18 = vpop.f32.mrf.mxu0 }
  0xff   :  { %v879_v19 = vpop.f32.mrf.mxu1  ;;  %v858_v24 = vadd.f32 %v857_v18, %v856_v16 }
 0x100   :  { %v859_v20 = vpop.f32.mrf.mxu0  ;;  %v880_v25 = vadd.f32 %v879_v19, %v878_v17 }
 0x101   :  { %v881_v21 = vpop.f32.mrf.mxu1 }
 0x102   :  { %v860_v22 = vpop.f32.mrf.mxu0  ;;  %v651_v29 = vadd.f32 %v880_v25, %v858_v24 }
 0x103   :  { %v882_v23 = vpop.f32.mrf.mxu1 }
 0x11c   :  { %v900_v26 = vpop.f32.mrf.mxu0 }
 0x11d   :  { %v922_v27 = vpop.f32.mrf.mxu1 }
 0x11e   :  { %v901_v28 = vpop.f32.mrf.mxu0 }
 0x11f   :  { %v902_v30 = vadd.f32 %v901_v28, %v900_v26  ;;  %v923_v31 = vpop.f32.mrf.mxu1 }
 0x120   :  { %v903_v32 = vpop.f32.mrf.mxu0  ;;  %v924_v34 = vadd.f32 %v923_v31, %v922_v27 }
 0x121   :  { %v691_v33 = vadd.f32 %v902_v30, %v651_v29  ;;  %v925_v35 = vpop.f32.mrf.mxu1 }
 0x122   :  { %v904_v37 = vpop.f32.mrf.mxu0 }
 0x123   :  { %v731_v38 = vadd.f32 %v924_v34, %v691_v33  ;;  %v926_v39 = vpop.f32.mrf.mxu1 }
 0x125   :  { %v749_v40 = vadd.f32 %v839_v36, %v731_v38 }
 0x127   :  { %997 = vtanh.f32 %v749_v40  ;;  %v753_v44 = vmax.f32 %v749_v40, 0.0 }
 0x134   :  { %v998_v43 = vpop.eup %997 }
 0x135   :  { %v756_v45 = vsel %vm754_vm0, %v998_v43, %v749_v40 }
 0x136   :  { %v757_v46 = vsel %vm752_vm1, %v753_v44, %v756_v45 }
 0x137   :  { %758 = vst [vmem:[#allocation8] sm:$0xff] %v757_v46 }
 0x138   :  { %1050 = shalt.err (!%p1047_p0)
}
 0x139   :  { %768 = dma.vmem_to_hbm [thread:$0]  %s766_s25, 128, %s1105_s3, [#allocation5]  }
 0x13a   :  { %1063 = dma.done.wait [#allocation5], 128  }
 0x13b   :  { %1064 = vsyncadd [#allocation5], 4294967168 }
 0x13c   :  { %772 = vsyncpa [#allocation4], 1 }
 0x13d   :  { %773 = vsyncpa [#allocation7], 1 }
 0x13e   :  { %774 = vsyncpa [#allocation5], 1 }

</bundles_post_ra>
